<compile_context>
chip_gen: v7x
topology: tpu7x:2x2x1
jax: 0.10.0
libtpu: 0.0.40
codegen_flags: <defaults>
</compile_context>

<pallas_src>
import functools

import jax
import jax.numpy as jnp
from jax.experimental import pallas as pl
from jax.experimental.pallas import tpu as pltpu


def _vmem_limit_bytes():
    """Generation-aware scoped-VMEM limit (~70% of physical VMEM per core)."""
    try:
        cap = int(pltpu.get_tpu_info().vmem_capacity_bytes)
    except Exception:
        cap = 64 << 20          # conservative fallback (v7x per-core VMEM)
    return int(cap * 0.70)


# ----------------------------------------------------------------------------
# Kernel A: depthwise conv on an NCHW block, per-(batch, channel-tile) BN partial
# statistics (sum, sum-of-squares) accumulated in f32.
# ----------------------------------------------------------------------------
def _depthwise_kernel(x_ref, w_ref, y_ref, sum_ref, sq_ref,
                      *, kh, kw, stride, dilation, ho, wo):
    ctile = x_ref.shape[1]

    acc = jnp.zeros((1, ctile, ho, wo), jnp.float32)
    for i in range(kh):                                   # static, small window
        for j in range(kw):
            if stride == 1:
                patch = x_ref[:, :, pl.ds(i * dilation, ho),
                              pl.ds(j * dilation, wo)]
            else:
                # strided ref load: only ho*wo elements touched per tap
                patch = x_ref[:, :, pl.ds(i * dilation, ho, stride=stride),
                              pl.ds(j * dilation, wo, stride=stride)]
            w_ij = w_ref[:, i:i + 1, j:j + 1].astype(jnp.float32)   # (ctile, 1, 1)
            acc = acc + patch.astype(jnp.float32) * w_ij[None]

    # NOTE: depthwise bias omitted on purpose — it cancels exactly under
    # training-mode BN (it only shifts the batch mean), so the forward output
    # is identical.  TODO(synk): fold the spatial zero-pad into this tap loop
    # (boundary-clipped per-tap ranges) to save the wrapper jnp.pad HBM pass.
    y_ref[...] = acc.astype(y_ref.dtype)

    # Per-(batch, channel-tile) BN partials; reduced across batch in the wrapper
    # so this grid stays fully "parallel".  E[x^2]-E[x]^2 variance is clamped >= 0
    # in the wrapper.  TODO(synk): Welford / centered pass for non-normalized inputs.
    s = jnp.sum(jnp.sum(acc, axis=3, keepdims=True), axis=2, keepdims=True)
    q = jnp.sum(jnp.sum(acc * acc, axis=3, keepdims=True), axis=2, keepdims=True)
    sum_ref[...] = s[:, None]          # (1, 1, ctile, 1, 1)
    sq_ref[...] = q[:, None]


# ----------------------------------------------------------------------------
# Kernel B: 1x1 pointwise conv with BN folded into (w, b), NCHW-flat layout.
# One (cout, cin) @ (cin, stile) MXU matmul per block; spatial axis on lanes.
# ----------------------------------------------------------------------------
def _pointwise_kernel(y_ref, w_ref, b_ref, o_ref):
    # y_ref: (1, cin, stile)  w_ref: (cout, cin)  b_ref: (cout, 1)  o_ref: (1, cout, stile)
    out = jnp.dot(w_ref[...], y_ref[0], preferred_element_type=jnp.float32)
    out = out + b_ref[...]
    o_ref[...] = out[None].astype(o_ref.dtype)


# ----------------------------------------------------------------------------
# Wrapper
# ----------------------------------------------------------------------------
def sep_conv2d(x_nchw, params, *, kernel_size, stride=1, padding=0, dilation=1,
               eps=1e-5, interm_dtype=jnp.bfloat16):
    kh = kw = kernel_size
    x = x_nchw.astype(jnp.float32)                 # NCHW kept end-to-end (no transpose)
    if padding:
        x = jnp.pad(x, ((0, 0), (0, 0), (padding, padding), (padding, padding)))
    n, c, hp, wp = x.shape
    eff_k = dilation * (kh - 1) + 1
    ho = (hp - eff_k) // stride + 1
    wo = (wp - eff_k) // stride + 1
    cout = params["pw_w"].shape[0]
    ity = jnp.dtype(interm_dtype).itemsize

    vmem_limit = _vmem_limit_bytes()
    blk_budget = int(vmem_limit * 0.85)            # headroom for compiler scratch

    # -------------------- Kernel A: depthwise + BN partial stats -----------------
    # double-buffered x/y blocks + f32 accumulator + padded weight/stat tiles
    per_chan = 2 * (hp * wp * 4 + ho * wo * ity) + ho * wo * 4 + 8192
    ctile = 1
    for d in range(c, 0, -1):                      # largest channel-tile that fits
        if c % d == 0 and d * per_chan <= blk_budget:
            ctile = d
            break
    # TODO(synk): add haloed H-tiling if a single channel plane exceeds the budget.
    nct = c // ctile

    depthwise = pl.pallas_call(
        functools.partial(_depthwise_kernel, kh=kh, kw=kw, stride=stride,
                          dilation=dilation, ho=ho, wo=wo),
        grid=(n, nct),
        in_specs=[
            pl.BlockSpec((1, ctile, hp, wp), lambda b, t: (b, t, 0, 0)),
            pl.BlockSpec((ctile, kh, kw), lambda b, t: (t, 0, 0)),
        ],
        out_specs=[
            pl.BlockSpec((1, ctile, ho, wo), lambda b, t: (b, t, 0, 0)),
            pl.BlockSpec((1, 1, ctile, 1, 1), lambda b, t: (b, t, 0, 0, 0)),
            pl.BlockSpec((1, 1, ctile, 1, 1), lambda b, t: (b, t, 0, 0, 0)),
        ],
        out_shape=[
            jax.ShapeDtypeStruct((n, c, ho, wo), interm_dtype),
            jax.ShapeDtypeStruct((n, nct, ctile, 1, 1), jnp.float32),
            jax.ShapeDtypeStruct((n, nct, ctile, 1, 1), jnp.float32),
        ],
        compiler_params=pltpu.CompilerParams(
            dimension_semantics=("parallel", "parallel"),
            vmem_limit_bytes=vmem_limit),
    )
    y, sums, sqs = depthwise(x, params["dw_w"])

    # --------- BN batch stats (nn.BatchNorm2d training mode, biased variance) ----
    count = float(n * ho * wo)
    mean = jnp.sum(sums.reshape(n, c), axis=0) / count
    var = jnp.maximum(jnp.sum(sqs.reshape(n, c), axis=0) / count - mean * mean, 0.0)
    # Depthwise bias shifts the mean by exactly dw_b and leaves the variance
    # unchanged, so it cancels in the normalized output (see kernel A note).
    scale = params["gamma"] * jax.lax.rsqrt(var + eps)
    shift = params["beta"] - mean * scale

    # Fold BN affine into the 1x1 conv:  W@(scale*y+shift)+b = (W*scale)@y + (W@shift+b)
    w_folded = (params["pw_w"] * scale[None, :]).astype(interm_dtype)       # (cout, c)
    b_folded = (params["pw_b"] + params["pw_w"] @ shift).astype(jnp.float32)
    b_folded = b_folded.reshape(cout, 1)

    # ----------------- Kernel B: pointwise, NCHW-flat, lane-dense ----------------
    # Free reshape (contiguous trailing dims) -> long spatial axis on the lanes.
    S = ho * wo
    y_flat = y.reshape(n, c, S)

    # TODO(synk): tile cout / the c contraction if the folded weight alone
    # approaches the VMEM budget (very large channel counts).
    b_budget = max(1, blk_budget - 2 * (cout * c * ity + cout * 4))
    per_col = 2 * (c * ity + cout * 4) + cout * 4
    max_cols = max(1, b_budget // per_col)
    if S <= max_cols:
        stile = S                                   # whole spatial slab per block
    else:
        stile = max(128, (max_cols // 128) * 128)   # lane-aligned large tile
    n_st = pl.cdiv(S, stile)

    pointwise = pl.pallas_call(
        _pointwise_kernel,
        grid=(n, n_st),
        in_specs=[
            pl.BlockSpec((1, c, stile), lambda b, t: (b, 0, t)),
            pl.BlockSpec((cout, c), lambda b, t: (0, 0)),
            pl.BlockSpec((cout, 1), lambda b, t: (0, 0)),
        ],
        out_specs=pl.BlockSpec((1, cout, stile), lambda b, t: (b, 0, t)),
        out_shape=jax.ShapeDtypeStruct((n, cout, S), jnp.float32),
        compiler_params=pltpu.CompilerParams(
            dimension_semantics=("parallel", "parallel"),
            vmem_limit_bytes=vmem_limit),
    )
    out = pointwise(y_flat, w_folded, b_folded)
    return out.reshape(n, cout, ho, wo)             # free reshape; already NCHW


# ----------------------------------------------------------------------------
# Deterministic parameter init (mimics PyTorch Conv2d uniform bounds; BN gamma=1, beta=0)
# ----------------------------------------------------------------------------
def init_params(key, in_channels, out_channels, kernel_size):
    k1, k2, k3, k4 = jax.random.split(key, 4)
    dw_bound = 1.0 / jnp.sqrt(kernel_size * kernel_size)   # fan_in = kh*kw (groups=C)
    pw_bound = 1.0 / jnp.sqrt(in_channels)                 # fan_in = C_in
    return {
        "dw_w": jax.random.uniform(k1, (in_channels, kernel_size, kernel_size),
                                   jnp.float32, -dw_bound, dw_bound),
        "dw_b": jax.random.uniform(k2, (in_channels,), jnp.float32, -dw_bound, dw_bound),
        "gamma": jnp.ones((in_channels,), jnp.float32),
        "beta": jnp.zeros((in_channels,), jnp.float32),
        "pw_w": jax.random.uniform(k3, (out_channels, in_channels),
                                   jnp.float32, -pw_bound, pw_bound),
        "pw_b": jax.random.uniform(k4, (out_channels,), jnp.float32, -pw_bound, pw_bound),
    }


# ----------------------------------------------------------------------------
# Pure-JAX reference (same math as the PyTorch module in default training mode)
# ----------------------------------------------------------------------------
def reference(x, p, *, stride, padding, dilation, eps=1e-5):
    c = x.shape[1]
    w = p["dw_w"][:, None, :, :]                                   # (C,1,kh,kw) OIHW
    y = jax.lax.conv_general_dilated(
        x, w, window_strides=(stride, stride),
        padding=[(padding, padding), (padding, padding)],
        rhs_dilation=(dilation, dilation),
        feature_group_count=c,
        dimension_numbers=("NCHW", "OIHW", "NCHW"))
    y = y + p["dw_b"][None, :, None, None]
    mean = jnp.mean(y, axis=(0, 2, 3))
    var = jnp.mean((y - mean[None, :, None, None]) ** 2, axis=(0, 2, 3))
    yhat = (y - mean[None, :, None, None]) * jax.lax.rsqrt(var + eps)[None, :, None, None]
    z = yhat * p["gamma"][None, :, None, None] + p["beta"][None, :, None, None]
    out = jnp.einsum("nchw,dc->ndhw", z, p["pw_w"]) + p["pw_b"][None, :, None, None]
    return out


if __name__ == "__main__":
    in_channels, out_channels, kernel_size = 4, 8, 3
    stride, padding, dilation = 1, 1, 1

    key = jax.random.PRNGKey(0)
    kx, kp = jax.random.split(key)
    x = jax.random.normal(kx, (2, in_channels, 16, 16), jnp.float32)
    params = init_params(kp, in_channels, out_channels, kernel_size)

    ref = reference(x, params, stride=stride, padding=padding, dilation=dilation)

    # f32 intermediate: exact-semantics check against the pure-JAX reference.
    out_f32 = sep_conv2d(x, params, kernel_size=kernel_size, stride=stride,
                         padding=padding, dilation=dilation,
                         interm_dtype=jnp.float32)
    out_f32 = jax.block_until_ready(out_f32)
    assert out_f32.shape == (2, out_channels, 16, 16), out_f32.shape
    assert jnp.allclose(out_f32, ref, atol=1e-3, rtol=1e-3), \
        float(jnp.max(jnp.abs(out_f32 - ref)))

    # bf16 intermediate (default; halves the y HBM round-trip): looser tolerance,
    # y is quantized to bf16 between the two kernels (stats stay f32).
    out_bf16 = sep_conv2d(x, params, kernel_size=kernel_size, stride=stride,
                          padding=padding, dilation=dilation,
                          interm_dtype=jnp.bfloat16)
    out_bf16 = jax.block_until_ready(out_bf16)
    assert out_bf16.shape == (2, out_channels, 16, 16), out_bf16.shape
    assert jnp.allclose(out_bf16, ref, atol=5e-2, rtol=5e-2), \
        float(jnp.max(jnp.abs(out_bf16 - ref)))

    print("KERNEL_OK")
</pallas_src>

<mosaic_0001>
module attributes {stable_mosaic.version = 11 : i64} {
  func.func @_depthwise_kernel(%arg0: i32, %arg1: i32, %arg2: memref<1x4x18x18xf32, #tpu.memory_space<vmem>>, %arg3: memref<4x3x3xf32, #tpu.memory_space<vmem>>, %arg4: memref<1x4x16x16xf32, #tpu.memory_space<vmem>>, %arg5: memref<1x1x4x1x1xf32, #tpu.memory_space<vmem>>, %arg6: memref<1x1x4x1x1xf32, #tpu.memory_space<vmem>>) attributes {dimension_semantics = [#tpu.dimension_semantics<parallel>, #tpu.dimension_semantics<parallel>], iteration_bounds = array<i64: 2, 1>, scalar_prefetch = 0 : i64, scratch_operands = 0 : i64, tpu.core_type = #tpu.core_type<tc>, window_params = [{transform_indices = @transform_0, window_bounds = array<i64: 1, 4, 18, 18>}, {transform_indices = @transform_1, window_bounds = array<i64: 4, 3, 3>}, {transform_indices = @transform_2, window_bounds = array<i64: 1, 4, 16, 16>}, {transform_indices = @transform_3, window_bounds = array<i64: 1, 1, 4, 1, 1>}, {transform_indices = @transform_4, window_bounds = array<i64: 1, 1, 4, 1, 1>}]} {
    %cst = arith.constant 0.000000e+00 : f32
    %0 = vector.broadcast %cst : f32 to vector<1x4x16x16xf32>
    %c0 = arith.constant 0 : index
    %c0_0 = arith.constant 0 : index
    %c0_1 = arith.constant 0 : index
    %c0_2 = arith.constant 0 : index
    %1 = vector.load %arg2[%c0, %c0_0, %c0_1, %c0_2] : memref<1x4x18x18xf32, #tpu.memory_space<vmem>>, vector<1x4x16x16xf32>
    %c0_3 = arith.constant 0 : index
    %c0_4 = arith.constant 0 : index
    %c0_5 = arith.constant 0 : index
    %2 = vector.load %arg3[%c0_3, %c0_4, %c0_5] : memref<4x3x3xf32, #tpu.memory_space<vmem>>, vector<4x1x1xf32>
    %3 = vector.shape_cast %2 : vector<4x1x1xf32> to vector<1x4x1x1xf32>
    %4 = vector.broadcast %3 : vector<1x4x1x1xf32> to vector<1x4x16x16xf32>
    %5 = arith.mulf %1, %4 : vector<1x4x16x16xf32>
    %6 = arith.addf %0, %5 : vector<1x4x16x16xf32>
    %c0_6 = arith.constant 0 : index
    %c0_7 = arith.constant 0 : index
    %c0_8 = arith.constant 0 : index
    %c1 = arith.constant 1 : index
    %7 = vector.load %arg2[%c0_6, %c0_7, %c0_8, %c1] : memref<1x4x18x18xf32, #tpu.memory_space<vmem>>, vector<1x4x16x16xf32>
    %c0_9 = arith.constant 0 : index
    %c0_10 = arith.constant 0 : index
    %c1_11 = arith.constant 1 : index
    %8 = vector.load %arg3[%c0_9, %c0_10, %c1_11] : memref<4x3x3xf32, #tpu.memory_space<vmem>>, vector<4x1x1xf32>
    %9 = vector.shape_cast %8 : vector<4x1x1xf32> to vector<1x4x1x1xf32>
    %10 = vector.broadcast %9 : vector<1x4x1x1xf32> to vector<1x4x16x16xf32>
    %11 = arith.mulf %7, %10 : vector<1x4x16x16xf32>
    %12 = arith.addf %6, %11 : vector<1x4x16x16xf32>
    %c0_12 = arith.constant 0 : index
    %c0_13 = arith.constant 0 : index
    %c0_14 = arith.constant 0 : index
    %c2 = arith.constant 2 : index
    %13 = vector.load %arg2[%c0_12, %c0_13, %c0_14, %c2] : memref<1x4x18x18xf32, #tpu.memory_space<vmem>>, vector<1x4x16x16xf32>
    %c0_15 = arith.constant 0 : index
    %c0_16 = arith.constant 0 : index
    %c2_17 = arith.constant 2 : index
    %14 = vector.load %arg3[%c0_15, %c0_16, %c2_17] : memref<4x3x3xf32, #tpu.memory_space<vmem>>, vector<4x1x1xf32>
    %15 = vector.shape_cast %14 : vector<4x1x1xf32> to vector<1x4x1x1xf32>
    %16 = vector.broadcast %15 : vector<1x4x1x1xf32> to vector<1x4x16x16xf32>
    %17 = arith.mulf %13, %16 : vector<1x4x16x16xf32>
    %18 = arith.addf %12, %17 : vector<1x4x16x16xf32>
    %c0_18 = arith.constant 0 : index
    %c0_19 = arith.constant 0 : index
    %c1_20 = arith.constant 1 : index
    %c0_21 = arith.constant 0 : index
    %19 = vector.load %arg2[%c0_18, %c0_19, %c1_20, %c0_21] : memref<1x4x18x18xf32, #tpu.memory_space<vmem>>, vector<1x4x16x16xf32>
    %c0_22 = arith.constant 0 : index
    %c1_23 = arith.constant 1 : index
    %c0_24 = arith.constant 0 : index
    %20 = vector.load %arg3[%c0_22, %c1_23, %c0_24] : memref<4x3x3xf32, #tpu.memory_space<vmem>>, vector<4x1x1xf32>
    %21 = vector.shape_cast %20 : vector<4x1x1xf32> to vector<1x4x1x1xf32>
    %22 = vector.broadcast %21 : vector<1x4x1x1xf32> to vector<1x4x16x16xf32>
    %23 = arith.mulf %19, %22 : vector<1x4x16x16xf32>
    %24 = arith.addf %18, %23 : vector<1x4x16x16xf32>
    %c0_25 = arith.constant 0 : index
    %c0_26 = arith.constant 0 : index
    %c1_27 = arith.constant 1 : index
    %c1_28 = arith.constant 1 : index
    %25 = vector.load %arg2[%c0_25, %c0_26, %c1_27, %c1_28] : memref<1x4x18x18xf32, #tpu.memory_space<vmem>>, vector<1x4x16x16xf32>
    %c0_29 = arith.constant 0 : index
    %c1_30 = arith.constant 1 : index
    %c1_31 = arith.constant 1 : index
    %26 = vector.load %arg3[%c0_29, %c1_30, %c1_31] : memref<4x3x3xf32, #tpu.memory_space<vmem>>, vector<4x1x1xf32>
    %27 = vector.shape_cast %26 : vector<4x1x1xf32> to vector<1x4x1x1xf32>
    %28 = vector.broadcast %27 : vector<1x4x1x1xf32> to vector<1x4x16x16xf32>
    %29 = arith.mulf %25, %28 : vector<1x4x16x16xf32>
    %30 = arith.addf %24, %29 : vector<1x4x16x16xf32>
    %c0_32 = arith.constant 0 : index
    %c0_33 = arith.constant 0 : index
    %c1_34 = arith.constant 1 : index
    %c2_35 = arith.constant 2 : index
    %31 = vector.load %arg2[%c0_32, %c0_33, %c1_34, %c2_35] : memref<1x4x18x18xf32, #tpu.memory_space<vmem>>, vector<1x4x16x16xf32>
    %c0_36 = arith.constant 0 : index
    %c1_37 = arith.constant 1 : index
    %c2_38 = arith.constant 2 : index
    %32 = vector.load %arg3[%c0_36, %c1_37, %c2_38] : memref<4x3x3xf32, #tpu.memory_space<vmem>>, vector<4x1x1xf32>
    %33 = vector.shape_cast %32 : vector<4x1x1xf32> to vector<1x4x1x1xf32>
    %34 = vector.broadcast %33 : vector<1x4x1x1xf32> to vector<1x4x16x16xf32>
    %35 = arith.mulf %31, %34 : vector<1x4x16x16xf32>
    %36 = arith.addf %30, %35 : vector<1x4x16x16xf32>
    %c0_39 = arith.constant 0 : index
    %c0_40 = arith.constant 0 : index
    %c2_41 = arith.constant 2 : index
    %c0_42 = arith.constant 0 : index
    %37 = vector.load %arg2[%c0_39, %c0_40, %c2_41, %c0_42] : memref<1x4x18x18xf32, #tpu.memory_space<vmem>>, vector<1x4x16x16xf32>
    %c0_43 = arith.constant 0 : index
    %c2_44 = arith.constant 2 : index
    %c0_45 = arith.constant 0 : index
    %38 = vector.load %arg3[%c0_43, %c2_44, %c0_45] : memref<4x3x3xf32, #tpu.memory_space<vmem>>, vector<4x1x1xf32>
    %39 = vector.shape_cast %38 : vector<4x1x1xf32> to vector<1x4x1x1xf32>
    %40 = vector.broadcast %39 : vector<1x4x1x1xf32> to vector<1x4x16x16xf32>
    %41 = arith.mulf %37, %40 : vector<1x4x16x16xf32>
    %42 = arith.addf %36, %41 : vector<1x4x16x16xf32>
    %c0_46 = arith.constant 0 : index
    %c0_47 = arith.constant 0 : index
    %c2_48 = arith.constant 2 : index
    %c1_49 = arith.constant 1 : index
    %43 = vector.load %arg2[%c0_46, %c0_47, %c2_48, %c1_49] : memref<1x4x18x18xf32, #tpu.memory_space<vmem>>, vector<1x4x16x16xf32>
    %c0_50 = arith.constant 0 : index
    %c2_51 = arith.constant 2 : index
    %c1_52 = arith.constant 1 : index
    %44 = vector.load %arg3[%c0_50, %c2_51, %c1_52] : memref<4x3x3xf32, #tpu.memory_space<vmem>>, vector<4x1x1xf32>
    %45 = vector.shape_cast %44 : vector<4x1x1xf32> to vector<1x4x1x1xf32>
    %46 = vector.broadcast %45 : vector<1x4x1x1xf32> to vector<1x4x16x16xf32>
    %47 = arith.mulf %43, %46 : vector<1x4x16x16xf32>
    %48 = arith.addf %42, %47 : vector<1x4x16x16xf32>
    %c0_53 = arith.constant 0 : index
    %c0_54 = arith.constant 0 : index
    %c2_55 = arith.constant 2 : index
    %c2_56 = arith.constant 2 : index
    %49 = vector.load %arg2[%c0_53, %c0_54, %c2_55, %c2_56] : memref<1x4x18x18xf32, #tpu.memory_space<vmem>>, vector<1x4x16x16xf32>
    %c0_57 = arith.constant 0 : index
    %c2_58 = arith.constant 2 : index
    %c2_59 = arith.constant 2 : index
    %50 = vector.load %arg3[%c0_57, %c2_58, %c2_59] : memref<4x3x3xf32, #tpu.memory_space<vmem>>, vector<4x1x1xf32>
    %51 = vector.shape_cast %50 : vector<4x1x1xf32> to vector<1x4x1x1xf32>
    %52 = vector.broadcast %51 : vector<1x4x1x1xf32> to vector<1x4x16x16xf32>
    %53 = arith.mulf %49, %52 : vector<1x4x16x16xf32>
    %54 = arith.addf %48, %53 : vector<1x4x16x16xf32>
    %c0_60 = arith.constant 0 : index
    %c0_61 = arith.constant 0 : index
    %c0_62 = arith.constant 0 : index
    %c0_63 = arith.constant 0 : index
    %55 = vector.load %arg4[%c0_60, %c0_61, %c0_62, %c0_63] : memref<1x4x16x16xf32, #tpu.memory_space<vmem>>, vector<1x4x16x16xf32>
    tpu.vector_store %arg4[%c0_60, %c0_61, %c0_62, %c0_63], %54 {strides = array<i32>} : memref<1x4x16x16xf32, #tpu.memory_space<vmem>>, vector<1x4x16x16xf32>,
    %cst_64 = arith.constant dense<0.000000e+00> : vector<1x4x16xf32>
    %56 = vector.multi_reduction <add>, %54, %cst_64 [3] : vector<1x4x16x16xf32> to vector<1x4x16xf32>
    %57 = vector.shape_cast %56 : vector<1x4x16xf32> to vector<1x4x16x1xf32>
    %cst_65 = arith.constant dense<0.000000e+00> : vector<1x4x1xf32>
    %58 = vector.multi_reduction <add>, %57, %cst_65 [2] : vector<1x4x16x1xf32> to vector<1x4x1xf32>
    %59 = vector.shape_cast %58 : vector<1x4x1xf32> to vector<1x4x1x1xf32>
    %60 = arith.mulf %54, %54 : vector<1x4x16x16xf32>
    %cst_66 = arith.constant dense<0.000000e+00> : vector<1x4x16xf32>
    %61 = vector.multi_reduction <add>, %60, %cst_66 [3] : vector<1x4x16x16xf32> to vector<1x4x16xf32>
    %62 = vector.shape_cast %61 : vector<1x4x16xf32> to vector<1x4x16x1xf32>
    %cst_67 = arith.constant dense<0.000000e+00> : vector<1x4x1xf32>
    %63 = vector.multi_reduction <add>, %62, %cst_67 [2] : vector<1x4x16x1xf32> to vector<1x4x1xf32>
    %64 = vector.shape_cast %63 : vector<1x4x1xf32> to vector<1x4x1x1xf32>
    %65 = vector.shape_cast %59 : vector<1x4x1x1xf32> to vector<1x1x4x1x1xf32>
    %c0_68 = arith.constant 0 : index
    %c0_69 = arith.constant 0 : index
    %c0_70 = arith.constant 0 : index
    %c0_71 = arith.constant 0 : index
    %c0_72 = arith.constant 0 : index
    %66 = vector.load %arg5[%c0_68, %c0_69, %c0_70, %c0_71, %c0_72] : memref<1x1x4x1x1xf32, #tpu.memory_space<vmem>>, vector<1x1x4x1x1xf32>
    tpu.vector_store %arg5[%c0_68, %c0_69, %c0_70, %c0_71, %c0_72], %65 {strides = array<i32>} : memref<1x1x4x1x1xf32, #tpu.memory_space<vmem>>, vector<1x1x4x1x1xf32>,
    %67 = vector.shape_cast %64 : vector<1x4x1x1xf32> to vector<1x1x4x1x1xf32>
    %c0_73 = arith.constant 0 : index
    %c0_74 = arith.constant 0 : index
    %c0_75 = arith.constant 0 : index
    %c0_76 = arith.constant 0 : index
    %c0_77 = arith.constant 0 : index
    %68 = vector.load %arg6[%c0_73, %c0_74, %c0_75, %c0_76, %c0_77] : memref<1x1x4x1x1xf32, #tpu.memory_space<vmem>>, vector<1x1x4x1x1xf32>
    tpu.vector_store %arg6[%c0_73, %c0_74, %c0_75, %c0_76, %c0_77], %67 {strides = array<i32>} : memref<1x1x4x1x1xf32, #tpu.memory_space<vmem>>, vector<1x1x4x1x1xf32>,
    return
  }
  func.func @transform_0(%arg0: i32, %arg1: i32) -> (i32, i32, i32, i32) {
    %c0_i32 = arith.constant 0 : i32
    %c0_i32_0 = arith.constant 0 : i32
    %c0_i32_1 = arith.constant 0 : i32
    return %arg0, %arg1, %c0_i32, %c0_i32_0 : i32, i32, i32, i32
  }
  func.func @transform_1(%arg0: i32, %arg1: i32) -> (i32, i32, i32) {
    %c0_i32 = arith.constant 0 : i32
    %c0_i32_0 = arith.constant 0 : i32
    %c0_i32_1 = arith.constant 0 : i32
    return %arg1, %c0_i32, %c0_i32_0 : i32, i32, i32
  }
  func.func @transform_2(%arg0: i32, %arg1: i32) -> (i32, i32, i32, i32) {
    %c0_i32 = arith.constant 0 : i32
    %c0_i32_0 = arith.constant 0 : i32
    %c0_i32_1 = arith.constant 0 : i32
    return %arg0, %arg1, %c0_i32, %c0_i32_0 : i32, i32, i32, i32
  }
  func.func @transform_3(%arg0: i32, %arg1: i32) -> (i32, i32, i32, i32, i32) {
    %c0_i32 = arith.constant 0 : i32
    %c0_i32_0 = arith.constant 0 : i32
    %c0_i32_1 = arith.constant 0 : i32
    %c0_i32_2 = arith.constant 0 : i32
    return %arg0, %arg1, %c0_i32, %c0_i32_0, %c0_i32_1 : i32, i32, i32, i32, i32
  }
  func.func @transform_4(%arg0: i32, %arg1: i32) -> (i32, i32, i32, i32, i32) {
    %c0_i32 = arith.constant 0 : i32
    %c0_i32_0 = arith.constant 0 : i32
    %c0_i32_1 = arith.constant 0 : i32
    %c0_i32_2 = arith.constant 0 : i32
    return %arg0, %arg1, %c0_i32, %c0_i32_0, %c0_i32_1 : i32, i32, i32, i32, i32
  }
}

</mosaic_0001>

<bundles_post_ra>
// kernel: tpu_custom_call.1
= control target key start
LH: loop header
LB: loop body
LE: loop exit
PB: predicated region body
PF: predicated region fallthrough
CT: control target
= control target key end

     0   :  { %s1955_s0 = inlined_call_operand.vmem [shape: f32[2,4,18,18], index: 0, kind: input, shape index: {}]   ;;  %s1956_s1 = inlined_call_operand.vmem [shape: f32[4,3,3], index: 1, kind: input, shape index: {}]   ;;  %s1957_s2 = inlined_call_operand.hbm [shape: f32[2,4,16,16], index: 2, kind: output, shape index: {0}]   ;;  %s1958_s3 = inlined_call_operand.vmem [shape: f32[2,1,4,1,1], index: 3, kind: output, shape index: {1}]   ;;  %s1959_s4 = inlined_call_operand.vmem [shape: f32[2,1,4,1,1], index: 4, kind: output, shape index: {2}]  }
   0x1   :  { %1964 = sst [smem:[#allocation5_spill]] %s1955_s0 }
   0x2   :  { %10 = vsyncpa [#allocation3], 0 }
   0x3   :  { %12 = vsyncpa [#allocation3 + $0x1], 0  ;;  %s1429_s15 = smov 0   ;;  %s1431_s16 = smov 0  }
   0x4   :  { %s1433_s17 = smov 0   ;;  %s1435_s18 = smov 0  }
   0x5   :  { %s1437_s19 = smov 0   ;;  %s1439_s20 = smov 0  }
   0x6 LB: > { %s1171_s21 = sadd.s32 4294967295, %s1397_s20   ;;  %s1172_s22 = sadd.s32 4294967294, %s1397_s20   ;;  %s1397_s20 = sphi %s1439_s20, %s18_s20   ;;  %s1393_s19 = sphi %s1437_s19, %s1974_s19   ;;  %s1389_s18 = sphi %s1435_s18, %s1973_s18   ;;  %s1385_s17 = sphi %s1433_s17, %s1972_s17   ;;  %s1381_s16 = sphi %s1431_s16, %s1971_s16   ;;  %s1377_s15 = sphi %s1429_s15, %s1970_s15  }
   0x7   : > { %s30_s23 = sadd.s32 1, %s1393_s19  ;;  %s93_s24 = sadd.s32 1, %s1385_s17 }
   0x8   : > { %p32_p0 = scmp.ge.s32.totalorder %s30_s23, 2  ;;  %p103_p1 = scmp.ne.s32.totalorder %s1385_s17, %s1381_s16 }
   0x9   : > { %p104_p2 = scmp.eq.s32.totalorder %s1171_s21, 1  ;;  %p109_p3 = scmp.ne.s32.totalorder %s1381_s16, %s1377_s15 }
   0xa   : > { %s1976_s23 = smov (%p32_p0, %s30_s23), 0  ;;  %p110_p5 = scmp.eq.s32.totalorder %s1172_s22, 1 }
   0xb   : > { %p1469_p4 = por %p104_p2, %p103_p1  ;;  %s88_s26 = ssub.s32 %s1393_s19, %s1976_s23 }
   0xc   : > { %p1176_p6 = scmp.ge.s32.totalorder %s1397_s20, 1  ;;  %p91_p7 = scmp.eq.s32.totalorder %s88_s26, 0 }
   0xd   : > { %p1476_p8 = por %p110_p5, %p109_p3  ;;  %p207_p9 = scmp.lt.s32.totalorder %s1397_s20, 3 }
   0xe   : > { %s1482_s28 = scalar_select %p91_p7, %s1385_s17, %s93_s24  }
   0xf   : > { %p208_p10 = pnand %p1176_p6, %p207_p9 }
  0x10   : > { %v301_v0 = vld [vmem:[%s1956_s1] sm:$0x1] (!%p208_p10)  ;;  %s1960_s5 = smov (!%p208_p10), 127   ;;  %v302_v1 = vld [vmem:[%s1956_s1 + $0x4] sm:$0x1] (!%p208_p10)  ;;  %s1962_s12 = smov (!%p208_p10), 126  }
  0x11   : > { %211 = sbr.rel (%p208_p10) target bundleno = 572 (0x23c), region = 28  ;;  %337 = vrot.lane.b32.xlu0 (!%p208_p10), %v301_v0, %s1960_s5  ;;  %v303_v2 = vld [vmem:[%s1956_s1 + $0x8] sm:$0x1] (!%p208_p10)  ;;  %1188 = vpush (!%p208_p10), %v301_v0  ;;  %v304_v3 = vld [vmem:[%s1956_s1 + $0xc] sm:$0x1] (!%p208_p10)  ;;  %p260_p11 = scmp.lt.s32.totalorder (!%p208_p10), %s1389_s18, 1 }
  0x12   : > { %341 = vrot.lane.b32.xlu1 (!%p208_p10), %v303_v2, %s1960_s5  ;;  %1190 = vpush (!%p208_p10), %v302_v1  ;;  %v481_v4 = vld [vmem:[%s1956_s1 + $0x1] sm:$0x1] (!%p208_p10)  ;;  %v482_v5 = vld [vmem:[%s1956_s1 + $0x5] sm:$0x1] (!%p208_p10)  ;;  %v483_v6 = vld [vmem:[%s1956_s1 + $0x9] sm:$0x1] (!%p208_p10) }
  0x13   : > { %1192 = vpush (!%p208_p10), %v303_v2  ;;  %v484_v7 = vld [vmem:[%s1956_s1 + $0xd] sm:$0x1] (!%p208_p10)  ;;  %v661_v8 = vld [vmem:[%s1956_s1 + $0x2] sm:$0x1] (!%p208_p10)  ;;  %v662_v9 = vld [vmem:[%s1956_s1 + $0x6] sm:$0x1] (!%p208_p10) }
  0x14   : > { %1194 = vpush (!%p208_p10), %v304_v3  ;;  %v663_v10 = vld [vmem:[%s1956_s1 + $0xa] sm:$0x1] (!%p208_p10)  ;;  %v664_v11 = vld [vmem:[%s1956_s1 + $0xe] sm:$0x1] (!%p208_p10)  ;;  %s1967_s0 = sld [smem:[#allocation5_spill]] (!%p208_p10)  ;;  %vm833_vm0 = vcmask (!%p208_p10), 130048  }
  0x15   : > { %339 = vrot.lane.b32.xlu0 (!%p208_p10), %v302_v1, %s1960_s5 }
  0x16   : > { %343 = vrot.lane.b32.xlu1 (!%p208_p10), %v304_v3, %s1960_s5 }
  0x18   : > { %s1546_s21 = scalar_select %p260_p11, %s1389_s18, 1 }
  0x19   : > { %405 = vrot.lane.b32.xlu0 %v301_v0, %s1962_s12 }
  0x1a   : > { %407 = vrot.lane.b32.xlu1 %v302_v1, %s1962_s12  ;;  %s1187_s22 = smul.u32 96, %s1546_s21 }
  0x1c   : > { %s1556_s6 = scalar_lea.vmem %s1967_s0, %s1187_s22 }
  0x1d   : > { %409 = vrot.lane.b32.xlu0 %v303_v2, %s1962_s12  ;;  %v1563_v36 = vld [vmem:[%s1556_s6] sm:$0xff]  ;;  %v1566_v37 = vld [vmem:[%s1556_s6 + $0x8] sm:$0xff]  ;;  %v1573_v41 = vld [vmem:[%s1556_s6 + $0x18] sm:$0xff] }
  0x1e   : > { %411 = vrot.lane.b32.xlu1 %v304_v3, %s1962_s12  ;;  %v1576_v42 = vld [vmem:[%s1556_s6 + $0x20] sm:$0xff]  ;;  %v1581_v47 = vld [vmem:[%s1556_s6 + $0x30] sm:$0xff]  ;;  %v1584_v48 = vld [vmem:[%s1556_s6 + $0x38] sm:$0xff] }
  0x1f   : > { %v1591_v52 = vld [vmem:[%s1556_s6 + $0x48] sm:$0xff]  ;;  %v1594_v53 = vld [vmem:[%s1556_s6 + $0x50] sm:$0xff]  ;;  %v1613_v59 = vld [vmem:[%s1556_s6 + $0x19] sm:$0xff] }
  0x20   : > { %v1607_v57 = vld [vmem:[%s1556_s6 + $0x1] sm:$0xff]  ;;  %v1610_v58 = vld [vmem:[%s1556_s6 + $0x9] sm:$0xff]  ;;  %v1620_v63 = vld [vmem:[%s1556_s6 + $0x31] sm:$0xff] }
  0x21   : > { %517 = vrot.lane.b32.xlu0 %v481_v4, %s1960_s5  ;;  %v1616_v60 = vld [vmem:[%s1556_s6 + $0x21] sm:$0xff]  ;;  %v1623_v0 = vld [vmem:[%s1556_s6 + $0x39] sm:$0xff]  ;;  %v1626_v1 = vld [vmem:[%s1556_s6 + $0x49] sm:$0xff] }
  0x22   : > { %519 = vrot.lane.b32.xlu1 %v482_v5, %s1960_s5 }
  0x25   : > { %521 = vrot.lane.b32.xlu0 %v483_v6, %s1960_s5 }
  0x26   : > { %523 = vrot.lane.b32.xlu1 %v484_v7, %s1960_s5 }
  0x29   : > { %585 = vrot.lane.b32.xlu0 %v481_v4, %s1962_s12 }
  0x2a   : > { %587 = vrot.lane.b32.xlu1 %v482_v5, %s1962_s12 }
  0x2d   : > { %589 = vrot.lane.b32.xlu0 %v483_v6, %s1962_s12 }
  0x2e   : > { %591 = vrot.lane.b32.xlu1 %v484_v7, %s1962_s12 }
  0x31   : > { %697 = vrot.lane.b32.xlu0 %v661_v8, %s1960_s5 }
  0x32   : > { %699 = vrot.lane.b32.xlu1 %v662_v9, %s1960_s5 }
  0x35   : > { %701 = vrot.lane.b32.xlu0 %v663_v10, %s1960_s5 }
  0x36   : > { %703 = vrot.lane.b32.xlu1 %v664_v11, %s1960_s5 }
  0x39   : > { %765 = vrot.lane.b32.xlu0 %v661_v8, %s1962_s12 }
  0x3a   : > { %767 = vrot.lane.b32.xlu1 %v662_v9, %s1962_s12 }
  0x3d   : > { %769 = vrot.lane.b32.xlu0 %v663_v10, %s1962_s12 }
  0x3e   : > { %771 = vrot.lane.b32.xlu1 %v664_v11, %s1962_s12 }
  0x42   : > { %s1549_s24 = spop %1188 }
  0x43   : > { %s1551_s26 = spop %1190 }
  0x44   : > { %s1558_s7 = spop %1192 }
  0x45   : > { %s1560_s8 = spop %1194 }
  0x83   : > { %v338_v12 = vpop.permute.xlu0 %337 }
  0x84   : > { %1196 = vpush %v338_v12  ;;  %v342_v13 = vpop.permute.xlu1 %341 }
  0x87   : > { %v340_v14 = vpop.permute.xlu0 %339 }
  0x88   : > { %1198 = vpush %v340_v14  ;;  %v344_v15 = vpop.permute.xlu1 %343 }
  0x89   : > { %1200 = vpush %v342_v13 }
  0x8a   : > { %1202 = vpush %v344_v15 }
  0x8b   : > { %v406_v16 = vpop.permute.xlu0 %405 }
  0x8c   : > { %1204 = vpush %v406_v16  ;;  %v408_v17 = vpop.permute.xlu1 %407 }
  0x8d   : > { %1206 = vpush %v408_v17 }
  0x8f   : > { %v410_v18 = vpop.permute.xlu0 %409 }
  0x90   : > { %1208 = vpush %v410_v18  ;;  %v412_v19 = vpop.permute.xlu1 %411 }
  0x91   : > { %1210 = vpush %v412_v19 }
  0x92   : > { %1212 = vpush %v481_v4 }
  0x93   : > { %v518_v20 = vpop.permute.xlu0 %517  ;;  %1214 = vpush %v482_v5 }
  0x94   : > { %1216 = vpush %v483_v6  ;;  %v520_v21 = vpop.permute.xlu1 %519  ;;  %v1638_v6 = vld [vmem:[%s1556_s6 + $0x51] sm:$0xff] }
  0x95   : > { %1218 = vpush %v484_v7 }
  0x96   : > { %1220 = vpush %v518_v20 }
  0x97   : > { %1222 = vpush %v520_v21  ;;  %v522_v22 = vpop.permute.xlu0 %521 }
  0x98   : > { %1224 = vpush %v522_v22  ;;  %v524_v23 = vpop.permute.xlu1 %523 }
  0x99   : > { %1226 = vpush %v524_v23 }
  0x9b   : > { %v586_v24 = vpop.permute.xlu0 %585 }
  0x9c   : > { %1228 = vpush %v586_v24  ;;  %v588_v25 = vpop.permute.xlu1 %587 }
  0x9d   : > { %1230 = vpush %v588_v25  ;;  %v1688_v25 = vld [vmem:[%s1556_s6 + $0x2] sm:$0xff] }
  0x9f   : > { %v590_v26 = vpop.permute.xlu0 %589 }
  0xa0   : > { %1232 = vpush %v590_v26  ;;  %v592_v27 = vpop.permute.xlu1 %591  ;;  %v1691_v26 = vld [vmem:[%s1556_s6 + $0xa] sm:$0xff] }
  0xa1   : > { %1234 = vpush %v592_v27  ;;  %v1694_v27 = vld [vmem:[%s1556_s6 + $0x1a] sm:$0xff] }
  0xa2   : > { %1236 = vpush %v661_v8 }
  0xa3   : > { %v698_v28 = vpop.permute.xlu0 %697  ;;  %1238 = vpush %v662_v9 }
  0xa4   : > { %1240 = vpush %v663_v10  ;;  %v700_v29 = vpop.permute.xlu1 %699 }
  0xa5   : > { %1242 = vpush %v664_v11 }
  0xa6   : > { %1244 = vpush %v698_v28  ;;  %v1697_v28 = vld [vmem:[%s1556_s6 + $0x22] sm:$0xff] }
  0xa7   : > { %1246 = vpush %v700_v29  ;;  %v702_v30 = vpop.permute.xlu0 %701 }
  0xa8   : > { %1248 = vpush %v702_v30  ;;  %v704_v31 = vpop.permute.xlu1 %703 }
  0xa9   : > { %1250 = vpush %v704_v31  ;;  %v1701_v31 = vld [vmem:[%s1556_s6 + $0x32] sm:$0xff] }
  0xab   : > { %v766_v32 = vpop.permute.xlu0 %765 }
  0xac   : > { %1252 = vpush %v766_v32  ;;  %v768_v33 = vpop.permute.xlu1 %767  ;;  %v1704_v32 = vld [vmem:[%s1556_s6 + $0x3a] sm:$0xff] }
  0xad   : > { %1254 = vpush %v768_v33  ;;  %v1707_v33 = vld [vmem:[%s1556_s6 + $0x4a] sm:$0xff] }
  0xaf   : > { %v770_v34 = vpop.permute.xlu0 %769 }
  0xb0   : > { %1256 = vpush %v770_v34  ;;  %v772_v35 = vpop.permute.xlu1 %771 }
  0xb1   : > { %1258 = vpush %v772_v35 }
  0xb5   : > { %s1197_s9 = spop %1196 }
  0xb6   : > { %v346_v38 = vstv %s1197_s9 }
  0xb7   : > { %v357_v39 = vmul.f32 %v346_v38, %v1563_v36  ;;  %v358_v40 = vmul.f32 %v346_v38, %v1566_v37 }
  0xb9   : > { %s1199_s10 = spop %1198  ;;  %375 = vrot.lane.b32.xlu1 %v358_v40, %s1960_s5  ;;  %373 = vrot.lane.b32.xlu0 %v357_v39, %s1960_s5  ;;  %v1719_v40 = vld [vmem:[%s1556_s6 + $0x52] sm:$0xff] }
  0xba   : > { %v349_v43 = vstv %s1199_s10  ;;  %s1201_s11 = spop %1200 }
  0xbb   : > { %v359_v44 = vmul.f32 %v349_v43, %v1573_v41  ;;  %v360_v45 = vmul.f32 %v349_v43, %v1576_v42  ;;  %v352_v46 = vstv %s1201_s11  ;;  %s1203_s13 = spop %1202 }
  0xbc   : > { %v361_v49 = vmul.f32 %v352_v46, %v1581_v47  ;;  %v362_v50 = vmul.f32 %v352_v46, %v1584_v48  ;;  %v355_v51 = vstv %s1203_s13 }
  0xbd   : > { %379 = vrot.lane.b32.xlu1 %v360_v45, %s1960_s5  ;;  %377 = vrot.lane.b32.xlu0 %v359_v44, %s1960_s5  ;;  %s1205_s14 = spop %1204  ;;  %v363_v54 = vmul.f32 %v355_v51, %v1591_v52  ;;  %v364_v55 = vmul.f32 %v355_v51, %v1594_v53 }
  0xbe   : > { %s1596_s22 = spop %1206  ;;  %v414_v56 = vstv %s1205_s14 }
  0xbf   : > { %v425_v61 = vmul.f32 %v414_v56, %v1563_v36  ;;  %v426_v2 = vmul.f32 %v414_v56, %v1566_v37  ;;  %v417_v7 = vstv %s1596_s22 }
  0xc0   : > { %v427_v16 = vmul.f32 %v417_v7, %v1573_v41  ;;  %v428_v17 = vmul.f32 %v417_v7, %v1576_v42 }
  0xc1   : > { %383 = vrot.lane.b32.xlu1 %v362_v50, %s1960_s5  ;;  %381 = vrot.lane.b32.xlu0 %v361_v49, %s1960_s5  ;;  %s1602_s29 = spop %1208 }
  0xc2   : > { %s1604_s30 = spop %1210  ;;  %v420_v18 = vstv %s1602_s29 }
  0xc3   : > { %s1213_s9 = spop %1212  ;;  %v429_v19 = vmul.f32 %v420_v18, %v1581_v47  ;;  %v430_v20 = vmul.f32 %v420_v18, %v1584_v48  ;;  %v423_v21 = vstv %s1604_s30 }
  0xc4   : > { %v487_v62 = vstv %s1213_s9  ;;  %s1215_s10 = spop %1214  ;;  %v431_v22 = vmul.f32 %v423_v21, %v1591_v52  ;;  %v432_v23 = vmul.f32 %v423_v21, %v1594_v53 }
  0xc5   : > { %387 = vrot.lane.b32.xlu1 %v364_v55, %s1960_s5  ;;  %385 = vrot.lane.b32.xlu0 %v363_v54, %s1960_s5  ;;  %v1632_v3 = vmul.f32 %v487_v62, %v1607_v57  ;;  %v1635_v4 = vmul.f32 %v487_v62, %v1610_v58  ;;  %v491_v5 = vstv %s1215_s10  ;;  %s1217_s11 = spop %1216 }
  0xc6   : > { %v1642_v8 = vmul.f32 %v491_v5, %v1613_v59  ;;  %v1645_v9 = vmul.f32 %v491_v5, %v1616_v60  ;;  %v495_v10 = vstv %s1217_s11  ;;  %s1219_s13 = spop %1218 }
  0xc7   : > { %v1648_v11 = vmul.f32 %v495_v10, %v1620_v63  ;;  %v1651_v12 = vmul.f32 %v495_v10, %v1623_v0  ;;  %v499_v13 = vstv %s1219_s13  ;;  %s1221_s14 = spop %1220 }
  0xc8   : > { %v1654_v14 = vmul.f32 %v499_v13, %v1626_v1  ;;  %v1657_v15 = vmul.f32 %v499_v13, %v1638_v6  ;;  %s1664_s22 = spop %1222  ;;  %v526_v24 = vstv %s1221_s14  ;;  %s1968_s14 = smov 126  }
  0xc9   : > { %443 = vrot.lane.b32.xlu1 %v426_v2, %s1962_s12  ;;  %441 = vrot.lane.b32.xlu0 %v425_v61, %s1962_s12  ;;  %s1670_s9 = spop %1224  ;;  %v537_v29 = vmul.f32 %v526_v24, %v1607_v57  ;;  %v538_v34 = vmul.f32 %v526_v24, %v1610_v58  ;;  %v529_v43 = vstv %s1664_s22 }
  0xca   : > { %s1673_s10 = spop %1226  ;;  %v539_v56 = vmul.f32 %v529_v43, %v1613_v59  ;;  %v540_v61 = vmul.f32 %v529_v43, %v1616_v60  ;;  %v532_v62 = vstv %s1670_s9 }
  0xcb   : > { %v541_v2 = vmul.f32 %v532_v62, %v1620_v63  ;;  %v542_v5 = vmul.f32 %v532_v62, %v1623_v0  ;;  %v535_v7 = vstv %s1673_s10 }
  0xcc   : > { %v543_v10 = vmul.f32 %v535_v7, %v1626_v1  ;;  %v544_v13 = vmul.f32 %v535_v7, %v1638_v6 }
  0xcd   : > { %447 = vrot.lane.b32.xlu1 %v428_v17, %s1962_s12  ;;  %445 = vrot.lane.b32.xlu0 %v427_v16, %s1962_s12  ;;  %s1675_s29 = spop %1228 }
  0xce   : > { %s1677_s11 = spop %1230  ;;  %v594_v16 = vstv %s1675_s29 }
  0xcf   : > { %v605_v17 = vmul.f32 %v594_v16, %v1607_v57  ;;  %v606_v18 = vmul.f32 %v594_v16, %v1610_v58 }
  0xd1   : > { %451 = vrot.lane.b32.xlu1 %v430_v20, %s1962_s12  ;;  %449 = vrot.lane.b32.xlu0 %v429_v19, %s1962_s12  ;;  %s1683_s13 = spop %1232  ;;  %v597_v19 = vstv %s1677_s11 }
  0xd2   : > { %s1685_s30 = spop %1234  ;;  %v607_v20 = vmul.f32 %v597_v19, %v1613_v59  ;;  %v608_v21 = vmul.f32 %v597_v19, %v1616_v60 }
  0xd3   : > { %s1237_s5 = spop %1236  ;;  %v603_v58 = vstv %s1685_s30 }
  0xd4   : > { %v667_v30 = vstv %s1237_s5  ;;  %s1239_s12 = spop %1238  ;;  %v611_v24 = vmul.f32 %v603_v58, %v1626_v1  ;;  %v612_v59 = vmul.f32 %v603_v58, %v1638_v6 }
  0xd5   : > { %455 = vrot.lane.b32.xlu1 %v432_v23, %s1968_s14  ;;  %453 = vrot.lane.b32.xlu0 %v431_v22, %s1968_s14  ;;  %v1713_v35 = vmul.f32 %v667_v30, %v1688_v25  ;;  %v1716_v38 = vmul.f32 %v667_v30, %v1691_v26  ;;  %v671_v39 = vstv %s1239_s12  ;;  %s1241_s5 = spop %1240  ;;  %s1969_s12 = smov 127   ;;  %v600_v22 = vstv %s1683_s13 }
  0xd6   : > { %v1723_v44 = vmul.f32 %v671_v39, %v1694_v27  ;;  %v1726_v45 = vmul.f32 %v671_v39, %v1697_v28  ;;  %v675_v46 = vstv %s1241_s5  ;;  %s1243_s0 = spop %1242  ;;  %v609_v23 = vmul.f32 %v600_v22, %v1620_v63 }
  0xd7   : > { %v1729_v49 = vmul.f32 %v675_v46, %v1701_v31  ;;  %v1732_v50 = vmul.f32 %v675_v46, %v1704_v32  ;;  %v679_v51 = vstv %s1243_s0  ;;  %v610_v57 = vmul.f32 %v600_v22, %v1623_v0  ;;  %s1245_s0 = spop %1244 }
  0xd8   : > { %v1735_v54 = vmul.f32 %v679_v51, %v1707_v33  ;;  %v1738_v55 = vmul.f32 %v679_v51, %v1719_v40  ;;  %v706_v60 = vstv %s1245_s0  ;;  %s1247_s6 = spop %1246  ;;  %v315_v22 = vstv %s1558_s7 }
  0xd9   : > { %555 = vrot.lane.b32.xlu1 %v538_v34, %s1969_s12  ;;  %553 = vrot.lane.b32.xlu0 %v537_v29, %s1969_s12  ;;  %v717_v63 = vmul.f32 %v706_v60, %v1688_v25  ;;  %v718_v0 = vmul.f32 %v706_v60, %v1691_v26  ;;  %v709_v29 = vstv %s1247_s6  ;;  %s1249_s22 = spop %1248 }
  0xda   : > { %v719_v1 = vmul.f32 %v709_v29, %v1694_v27  ;;  %v720_v6 = vmul.f32 %v709_v29, %v1697_v28  ;;  %v712_v30 = vstv %s1249_s22  ;;  %s1251_s9 = spop %1250 }
  0xdb   : > { %v721_v34 = vmul.f32 %v712_v30, %v1701_v31  ;;  %v722_v39 = vmul.f32 %v712_v30, %v1704_v32  ;;  %v715_v43 = vstv %s1251_s9 }
  0xdc   : > { %v723_v46 = vmul.f32 %v715_v43, %v1707_v33  ;;  %v724_v51 = vmul.f32 %v715_v43, %v1719_v40 }
  0xdd   : > { %559 = vrot.lane.b32.xlu1 %v540_v61, %s1969_s12  ;;  %557 = vrot.lane.b32.xlu0 %v539_v56, %s1969_s12  ;;  %s1253_s10 = spop %1252 }
  0xde   : > { %v774_v56 = vstv %s1253_s10  ;;  %s1255_s29 = spop %1254 }
  0xdf   : > { %v785_v61 = vmul.f32 %v774_v56, %v1688_v25  ;;  %v786_v62 = vmul.f32 %v774_v56, %v1691_v26 }
  0xe1   : > { %563 = vrot.lane.b32.xlu1 %v542_v5, %s1969_s12  ;;  %561 = vrot.lane.b32.xlu0 %v541_v2, %s1969_s12  ;;  %v777_v2 = vstv %s1255_s29  ;;  %s1257_s11 = spop %1256 }
  0xe2   : > { %v787_v5 = vmul.f32 %v777_v2, %v1694_v27  ;;  %v788_v7 = vmul.f32 %v777_v2, %v1697_v28  ;;  %s1259_s13 = spop %1258 }
  0xe5   : > { %567 = vrot.lane.b32.xlu1 %v544_v13, %s1969_s12  ;;  %565 = vrot.lane.b32.xlu0 %v543_v10, %s1969_s12  ;;  %v780_v10 = vstv %s1257_s11  ;;  %v783_v13 = vstv %s1259_s13 }
  0xe6   : > { %v789_v25 = vmul.f32 %v780_v10, %v1701_v31  ;;  %v790_v26 = vmul.f32 %v780_v10, %v1704_v32  ;;  %v791_v27 = vmul.f32 %v783_v13, %v1707_v33  ;;  %v792_v28 = vmul.f32 %v783_v13, %v1719_v40 }
  0xe7   : > { %v307_v31 = vstv %s1549_s24  ;;  %s236_s24 = sand.u32 1, %s1381_s16  }
  0xe8   : > { %v321_v32 = vmul.f32 %v307_v31, %v1563_v36  ;;  %v322_v16 = vmul.f32 %v307_v31, %v1566_v37  ;;  %v326_v36 = vmul.f32 %v315_v22, %v1584_v48  ;;  %v319_v48 = vstv %s1560_s8  ;;  %s1186_s8 = sshll.u32 %s1389_s18, 10  ;;  %s1884_s0 = scalar_lea.sflag [#allocation3], %s236_s24 }
  0xe9   : > { %623 = vrot.lane.b32.xlu1 %v606_v18, %s1968_s14  ;;  %621 = vrot.lane.b32.xlu0 %v605_v17, %s1968_s14  ;;  %v311_v17 = vstv %s1551_s26  ;;  %s1177_s26 = sshll.u32 %s236_s24, 6  ;;  %s1401_s18 = smov [#allocation2]  }
  0xea   : > { %v323_v40 = vmul.f32 %v311_v17, %v1573_v41  ;;  %s1839_s7 = scalar_lea.vmem [#allocation2], %s1177_s26  ;;  %s1323_s22 = sshll.u32 %s1401_s18, 4  ;;  %s1324_s22 = int_to_ptr.vmem [resolvable:$false] %s1323_s22 }
  0xeb   : > { %s996_s30 = sshll.u32 %s1839_s7, 4  ;;  %s1325_s9 = scalar_lea.vmem %s1324_s22, 2048  ;;  %s1880_s30 = int_to_ptr.vmem [resolvable:$true] %s996_s30 }
  0xec   : > { %s1319_s6 = scalar_lea.vmem %s1880_s30, 1024  ;;  %p1326_p1 = scmp.lt.s32.totalorder %s1880_s30, %s1324_s22 }
  0xed   : > { %627 = vrot.lane.b32.xlu1 %v608_v21, %s1968_s14  ;;  %625 = vrot.lane.b32.xlu0 %v607_v20, %s1968_s14  ;;  %v324_v21 = vmul.f32 %v311_v17, %v1576_v42  ;;  %p1320_p12 = scmp.ne.s32.totalorder %s1880_s30, %s1319_s6  ;;  %p1327_p2 = scmp.lt.s32.totalorder %s1325_s9, %s1319_s6 }
  0xef   : > { %p1321_p13 = pnand %p1320_p12, %p1469_p4  ;;  %p1328_p3 = por %p1327_p2, %p1326_p1 }
  0xf1   : > { %631 = vrot.lane.b32.xlu1 %v610_v57, %s1968_s14  ;;  %629 = vrot.lane.b32.xlu0 %v609_v23, %s1968_s14  ;;  %p1322_p0 = pneg %p1321_p13 }
  0xf3   : > { %p1329_p5 = pnand %p1328_p3, %p1322_p0 }
  0xf5   : > { %635 = vrot.lane.b32.xlu1 %v612_v59, %s1968_s14  ;;  %633 = vrot.lane.b32.xlu0 %v611_v24, %s1968_s14  ;;  %v325_v59 = vmul.f32 %v315_v22, %v1581_v47 }
  0xf9   : > { %735 = vrot.lane.b32.xlu1 %v718_v0, %s1969_s12  ;;  %733 = vrot.lane.b32.xlu0 %v717_v63, %s1969_s12 }
  0xfd   : > { %739 = vrot.lane.b32.xlu1 %v720_v6, %s1969_s12  ;;  %737 = vrot.lane.b32.xlu0 %v719_v1, %s1969_s12 }
 0x101   : > { %743 = vrot.lane.b32.xlu1 %v722_v39, %s1969_s12  ;;  %741 = vrot.lane.b32.xlu0 %v721_v34, %s1969_s12 }
 0x105   : > { %747 = vrot.lane.b32.xlu1 %v724_v51, %s1969_s12  ;;  %745 = vrot.lane.b32.xlu0 %v723_v46, %s1969_s12  ;;  %s1878_s12 = scalar_lea.hbm %s1957_s2, %s1186_s8 }
 0x109   : > { %803 = vrot.lane.b32.xlu1 %v786_v62, %s1968_s14  ;;  %801 = vrot.lane.b32.xlu0 %v785_v61, %s1968_s14 }
 0x10d   : > { %807 = vrot.lane.b32.xlu1 %v788_v7, %s1968_s14  ;;  %805 = vrot.lane.b32.xlu0 %v787_v5, %s1968_s14  ;;  %v327_v5 = vmul.f32 %v319_v48, %v1591_v52  ;;  %v328_v7 = vmul.f32 %v319_v48, %v1594_v53 }
 0x111   : > { %811 = vrot.lane.b32.xlu1 %v790_v26, %s1968_s14  ;;  %809 = vrot.lane.b32.xlu0 %v789_v25, %s1968_s14 }
 0x115   : > { %815 = vrot.lane.b32.xlu1 %v792_v28, %s1968_s14  ;;  %813 = vrot.lane.b32.xlu0 %v791_v27, %s1968_s14 }
 0x12b   : > { %v376_v18 = vpop.permute.xlu1 %375  ;;  %v374_v19 = vpop.permute.xlu0 %373 }
 0x12c   : > { %v398_v33 = vadd.f32 %v376_v18, %v322_v16  ;;  %v397_v20 = vadd.f32 %v374_v19, %v321_v32 }
 0x12f   : > { %v380_v23 = vpop.permute.xlu1 %379  ;;  %v378_v57 = vpop.permute.xlu0 %377 }
 0x130   : > { %v400_v58 = vadd.f32 %v380_v23, %v324_v21  ;;  %v399_v24 = vadd.f32 %v378_v57, %v323_v40 }
 0x133   : > { %v384_v60 = vpop.permute.xlu1 %383  ;;  %v382_v37 = vpop.permute.xlu0 %381 }
 0x134   : > { %v402_v63 = vadd.f32 %v384_v60, %v326_v36  ;;  %v401_v0 = vadd.f32 %v382_v37, %v325_v59 }
 0x137   : > { %v388_v29 = vpop.permute.xlu1 %387  ;;  %v386_v1 = vpop.permute.xlu0 %385 }
 0x138   : > { %v403_v26 = vadd.f32 %v386_v1, %v327_v5 }
 0x13b   : > { %v444_v6 = vpop.permute.xlu1 %443  ;;  %v442_v41 = vpop.permute.xlu0 %441 }
 0x13c   : > { %v466_v30 = vadd.f32 %v444_v6, %v398_v33  ;;  %v465_v42 = vadd.f32 %v442_v41, %v397_v20 }
 0x13e   : > { %v510_v34 = vadd.f32 %v1635_v4, %v466_v30  ;;  %v509_v39 = vadd.f32 %v1632_v3, %v465_v42  ;;  %v404_v4 = vadd.f32 %v388_v29, %v328_v7 }
 0x13f   : > { %v448_v43 = vpop.permute.xlu1 %447  ;;  %v446_v46 = vpop.permute.xlu0 %445 }
 0x140   : > { %v468_v47 = vadd.f32 %v448_v43, %v400_v58  ;;  %v467_v51 = vadd.f32 %v446_v46, %v399_v24 }
 0x142   : > { %v512_v56 = vadd.f32 %v1645_v9, %v468_v47  ;;  %v511_v61 = vadd.f32 %v1642_v8, %v467_v51 }
 0x143   : > { %v452_v62 = vpop.permute.xlu1 %451  ;;  %v450_v2 = vpop.permute.xlu0 %449 }
 0x144   : > { %v470_v10 = vadd.f32 %v452_v62, %v402_v63  ;;  %v469_v25 = vadd.f32 %v450_v2, %v401_v0 }
 0x146   : > { %v514_v3 = vadd.f32 %v1651_v12, %v470_v10  ;;  %v513_v13 = vadd.f32 %v1648_v11, %v469_v25 }
 0x147   : > { %v456_v27 = vpop.permute.xlu1 %455  ;;  %v454_v28 = vpop.permute.xlu0 %453 }
 0x148   : > { %v472_v31 = vadd.f32 %v456_v27, %v404_v4  ;;  %v471_v9 = vadd.f32 %v454_v28, %v403_v26 }
 0x14a   : > { %v516_v8 = vadd.f32 %v1657_v15, %v472_v31  ;;  %v515_v32 = vadd.f32 %v1654_v14, %v471_v9 }
 0x14b   : > { %v556_v16 = vpop.permute.xlu1 %555  ;;  %v554_v52 = vpop.permute.xlu0 %553 }
 0x14c   : > { %v578_v40 = vadd.f32 %v556_v16, %v510_v34  ;;  %v577_v12 = vadd.f32 %v554_v52, %v509_v39 }
 0x14f   : > { %v560_v17 = vpop.permute.xlu1 %559  ;;  %v558_v53 = vpop.permute.xlu0 %557 }
 0x150   : > { %v580_v57 = vadd.f32 %v560_v17, %v512_v56  ;;  %v579_v58 = vadd.f32 %v558_v53, %v511_v61 }
 0x153   : > { %v564_v18 = vpop.permute.xlu1 %563  ;;  %v562_v19 = vpop.permute.xlu0 %561 }
 0x154   : > { %v582_v37 = vadd.f32 %v564_v18, %v514_v3  ;;  %v581_v63 = vadd.f32 %v562_v19, %v513_v13 }
 0x157   : > { %v568_v33 = vpop.permute.xlu1 %567  ;;  %v566_v20 = vpop.permute.xlu0 %565 }
 0x158   : > { %v584_v42 = vadd.f32 %v568_v33, %v516_v8  ;;  %v583_v34 = vadd.f32 %v566_v20, %v515_v32 }
 0x15b   : > { %v624_v21 = vpop.permute.xlu1 %623  ;;  %v622_v11 = vpop.permute.xlu0 %621 }
 0x15c   : > { %v646_v22 = vadd.f32 %v624_v21, %v578_v40  ;;  %v645_v23 = vadd.f32 %v622_v11, %v577_v12 }
 0x15e   : > { %v690_v15 = vadd.f32 %v1716_v38, %v646_v22  ;;  %v689_v14 = vadd.f32 %v1713_v35, %v645_v23 }
 0x15f   : > { %v628_v24 = vpop.permute.xlu1 %627  ;;  %v626_v59 = vpop.permute.xlu0 %625 }
 0x160   : > { %v648_v36 = vadd.f32 %v628_v24, %v580_v57  ;;  %v647_v60 = vadd.f32 %v626_v59, %v579_v58 }
 0x162   : > { %v692_v0 = vadd.f32 %v1726_v45, %v648_v36  ;;  %v691_v29 = vadd.f32 %v1723_v44, %v647_v60 }
 0x163   : > { %v632_v1 = vpop.permute.xlu1 %631  ;;  %v630_v6 = vpop.permute.xlu0 %629 }
 0x164   : > { %v650_v41 = vadd.f32 %v632_v1, %v582_v37  ;;  %v649_v30 = vadd.f32 %v630_v6, %v581_v63 }
 0x166   : > { %v694_v38 = vadd.f32 %v1732_v50, %v650_v41  ;;  %v693_v35 = vadd.f32 %v1729_v49, %v649_v30 }
 0x167   : > { %v636_v39 = vpop.permute.xlu1 %635  ;;  %v634_v43 = vpop.permute.xlu0 %633 }
 0x168   : > { %v652_v46 = vadd.f32 %v636_v39, %v584_v42  ;;  %v651_v47 = vadd.f32 %v634_v43, %v583_v34 }
 0x16a   : > { %v696_v45 = vadd.f32 %v1738_v55, %v652_v46  ;;  %v695_v44 = vadd.f32 %v1735_v54, %v651_v47 }
 0x16b   : > { %v736_v51 = vpop.permute.xlu1 %735  ;;  %v734_v48 = vpop.permute.xlu0 %733 }
 0x16c   : > { %v758_v49 = vadd.f32 %v736_v51, %v690_v15  ;;  %v757_v7 = vadd.f32 %v734_v48, %v689_v14 }
 0x16f   : > { %v740_v56 = vpop.permute.xlu1 %739  ;;  %v738_v61 = vpop.permute.xlu0 %737 }
 0x170   : > { %v760_v26 = vadd.f32 %v740_v56, %v692_v0  ;;  %v759_v54 = vadd.f32 %v738_v61, %v691_v29 }
 0x173   : > { %v744_v62 = vpop.permute.xlu1 %743  ;;  %v742_v2 = vpop.permute.xlu0 %741 }
 0x174   : > { %v762_v8 = vadd.f32 %v744_v62, %v694_v38  ;;  %v761_v32 = vadd.f32 %v742_v2, %v693_v35 }
 0x177   : > { %v748_v5 = vpop.permute.xlu1 %747  ;;  %v746_v50 = vpop.permute.xlu0 %745 }
 0x178   : > { %v764_v19 = vadd.f32 %v748_v5, %v696_v45  ;;  %v763_v33 = vadd.f32 %v746_v50, %v695_v44 }
 0x17b   : > { %v804_v10 = vpop.permute.xlu1 %803  ;;  %v802_v25 = vpop.permute.xlu0 %801 }
 0x17c   : > { %v826_v4 = vadd.f32 %v804_v10, %v758_v49  ;;  %v825_v55 = vadd.f32 %v802_v25, %v757_v7 }
 0x17e   : > { %835 = vst.msk [vmem:[%s1839_s7 + $0x8] sm:$0xff] %vm833_vm0, %v826_v4  ;;  %834 = vst.msk [vmem:[%s1839_s7] sm:$0xff] %vm833_vm0, %v825_v55  ;;  %v845_v3 = vsel %vm833_vm0, %v826_v4, 0.0  ;;  %v842_v13 = vsel %vm833_vm0, %v825_v55, 0.0  ;;  %v894_v58 = vmul.f32 %v825_v55, %v825_v55  ;;  %v895_v59 = vmul.f32 %v826_v4, %v826_v4 }
 0x17f   : > { %v808_v27 = vpop.permute.xlu1 %807  ;;  %846 = vadd.xlane.f32.xlu1 %v845_v3  ;;  %v806_v28 = vpop.permute.xlu0 %805  ;;  %843 = vadd.xlane.f32.xlu0 %v842_v13 }
 0x180   : > { %v828_v31 = vadd.f32 %v808_v27, %v760_v26  ;;  %v827_v9 = vadd.f32 %v806_v28, %v759_v54  ;;  %v902_v15 = vsel %vm833_vm0, %v894_v58, 0.0  ;;  %v905_v60 = vsel %vm833_vm0, %v895_v59, 0.0 }
 0x182   : > { %837 = vst.msk [vmem:[%s1839_s7 + $0x18] sm:$0xff] %vm833_vm0, %v828_v31  ;;  %836 = vst.msk [vmem:[%s1839_s7 + $0x10] sm:$0xff] %vm833_vm0, %v827_v9  ;;  %v848_v16 = vsel %vm833_vm0, %v827_v9, 0.0  ;;  %v851_v40 = vsel %vm833_vm0, %v828_v31, 0.0  ;;  %v896_v24 = vmul.f32 %v827_v9, %v827_v9  ;;  %v897_v63 = vmul.f32 %v828_v31, %v828_v31 }
 0x183   : > { %v812_v52 = vpop.permute.xlu1 %811  ;;  %v810_v17 = vpop.permute.xlu0 %809  ;;  %849 = vadd.xlane.f32.xlu0 %v848_v16 }
 0x184   : > { %v830_v53 = vadd.f32 %v812_v52, %v762_v8  ;;  %v829_v18 = vadd.f32 %v810_v17, %v761_v32  ;;  %v908_v36 = vsel %vm833_vm0, %v896_v24, 0.0  ;;  %v911_v29 = vsel %vm833_vm0, %v897_v63, 0.0 }
 0x186   : > { %839 = vst.msk [vmem:[%s1839_s7 + $0x28] sm:$0xff] %vm833_vm0, %v830_v53  ;;  %838 = vst.msk [vmem:[%s1839_s7 + $0x20] sm:$0xff] %vm833_vm0, %v829_v18  ;;  %v854_v20 = vsel %vm833_vm0, %v829_v18, 0.0  ;;  %v857_v57 = vsel %vm833_vm0, %v830_v53, 0.0  ;;  %v898_v37 = vmul.f32 %v829_v18, %v829_v18  ;;  %v899_v6 = vmul.f32 %v830_v53, %v830_v53 }
 0x187   : > { %v816_v12 = vpop.permute.xlu1 %815  ;;  %855 = vadd.xlane.f32.xlu1 %v854_v20  ;;  %v814_v21 = vpop.permute.xlu0 %813  ;;  %852 = vadd.xlane.f32.xlu0 %v851_v40 }
 0x188   : > { %v832_v11 = vadd.f32 %v816_v12, %v764_v19  ;;  %v831_v22 = vadd.f32 %v814_v21, %v763_v33  ;;  %v914_v0 = vsel %vm833_vm0, %v898_v37, 0.0  ;;  %v917_v30 = vsel %vm833_vm0, %v899_v6, 0.0 }
 0x18a   : > { %841 = vst.msk [vmem:[%s1839_s7 + $0x38] sm:$0xff] %vm833_vm0, %v832_v11  ;;  %840 = vst.msk [vmem:[%s1839_s7 + $0x30] sm:$0xff] %vm833_vm0, %v831_v22  ;;  %v860_v23 = vsel %vm833_vm0, %v831_v22, 0.0  ;;  %v863_v14 = vsel %vm833_vm0, %v832_v11, 0.0  ;;  %v900_v1 = vmul.f32 %v831_v22, %v831_v22  ;;  %v901_v42 = vmul.f32 %v832_v11, %v832_v11 }
 0x18b   : > { %861 = vadd.xlane.f32.xlu1 %v860_v23  ;;  %858 = vadd.xlane.f32.xlu0 %v857_v57 }
 0x18c   : > { %v920_v41 = vsel %vm833_vm0, %v900_v1, 0.0  ;;  %v923_v34 = vsel %vm833_vm0, %v901_v42, 0.0 }
 0x18f   : > { %903 = vadd.xlane.f32.xlu1 %v902_v15  ;;  %864 = vadd.xlane.f32.xlu0 %v863_v14 }
 0x193   : > { %909 = vadd.xlane.f32.xlu1 %v908_v36  ;;  %906 = vadd.xlane.f32.xlu0 %v905_v60 }
 0x197   : > { %915 = vadd.xlane.f32.xlu1 %v914_v0  ;;  %912 = vadd.xlane.f32.xlu0 %v911_v29 }
 0x19b   : > { %921 = vadd.xlane.f32.xlu1 %v920_v41  ;;  %918 = vadd.xlane.f32.xlu0 %v917_v30 }
 0x19f   : > { %924 = vadd.xlane.f32.xlu0 %v923_v34 }
 0x1a0   : > { %1332 = shalt.err (!%p1329_p5)
}
 0x1a1   : > { %s1333_s10 = scalar_lea.hbm %s1878_s12, 1024  ;;  %s1337_s13 = scalar_lea.hbm %s1957_s2, 2048 }
 0x1a2   : > { %p1334_p6 = scmp.ne.s32.totalorder %s1878_s12, %s1333_s10  ;;  %p1338_p10 = scmp.lt.u32.totalorder %s1878_s12, %s1957_s2 }
 0x1a3   : > { %p1339_p11 = scmp.lt.u32.totalorder %s1337_s13, %s1333_s10  ;;  %p1341_p13 = scmp.lt.u32.totalorder %s1333_s10, %s1878_s12 }
 0x1a4   : > { %p1335_p7 = pnand %p1334_p6, %p1469_p4 }
 0x1a5   : > { %p1340_p12 = por %p1339_p11, %p1338_p10 }
 0x1a6   : > { %p1336_p9 = pneg %p1335_p7 }
 0x1a7   : > { %p1342_p0 = por %p1341_p13, %p1340_p12 }
 0x1a9   : > { %p1343_p1 = pnand %p1342_p0, %p1336_p9 }
 0x1ab   : > { %1346 = shalt.err (!%p1343_p1)
}
 0x1ac   : > { %s1402_s7 = smov 128   ;;  %s1403_s8 = smov 8   ;;  %vm954_vm1 = vcmask 0  }
 0x1ad   : > { %1260 = dma.vmem_to_hbm [thread:$0]  (%p1469_p4), %s1880_s30, 1024, %s1878_s12, %s1884_s0, %s1402_s7, %s1402_s7, %s1403_s8  }
 0x1ae   : > { %s1179_s14 = sshll.u32 %s1546_s21, 2 }
 0x1af   : > { %s1914_s25 = scalar_lea.vmem %s1958_s3, %s1179_s14  ;;  %s292_s0 = scalar_lea.vmem %s1959_s4, %s1179_s14 }
 0x20c   : > { %v847_v38 = vpop.xlane.xlu1 %846  ;;  %v844_v35 = vpop.xlane.xlu0 %843 }
 0x20d   : > { %v866_v39 = vadd.f32 %v847_v38, %v844_v35 }
 0x20f   : > { %v867_v43 = vrot.slane %v866_v39, 4 }
 0x210   : > { %v850_v46 = vpop.xlane.xlu0 %849 }
 0x211   : > { %v868_v47 = vadd.f32 %v867_v43, %v866_v39 }
 0x213   : > { %v869_v45 = vrot.slane %v868_v47, 2 }
 0x214   : > { %v856_v44 = vpop.xlane.xlu1 %855  ;;  %v853_v51 = vpop.xlane.xlu0 %852 }
 0x215   : > { %v870_v48 = vadd.f32 %v869_v45, %v868_v47  ;;  %v873_v56 = vadd.f32 %v853_v51, %v850_v46 }
 0x217   : > { %v871_v61 = vrot.slane %v870_v48, 1  ;;  %v874_v62 = vrot.slane %v873_v56, 4 }
 0x218   : > { %v862_v2 = vpop.xlane.xlu1 %861  ;;  %v859_v5 = vpop.xlane.xlu0 %858 }
 0x219   : > { %v872_v50 = vadd.f32 %v871_v61, %v870_v48  ;;  %v875_v49 = vadd.f32 %v874_v62, %v873_v56  ;;  %v880_v7 = vadd.f32 %v859_v5, %v856_v44 }
 0x21b   : > { %955 = vst.msk [vmem:[%s1914_s25] sm:$0x1] %vm954_vm1, %v872_v50  ;;  %v876_v10 = vrot.slane %v875_v49, 2  ;;  %v881_v25 = vrot.slane %v880_v7, 4 }
 0x21c   : > { %v904_v4 = vpop.xlane.xlu1 %903  ;;  %v865_v55 = vpop.xlane.xlu0 %864 }
 0x21d   : > { %v877_v26 = vadd.f32 %v876_v10, %v875_v49  ;;  %v882_v54 = vadd.f32 %v881_v25, %v880_v7  ;;  %v887_v3 = vadd.f32 %v865_v55, %v862_v2 }
 0x21f   : > { %v878_v13 = vrot.slane %v877_v26, 1  ;;  %v883_v27 = vrot.slane %v882_v54, 2  ;;  %v888_v28 = vrot.slane %v887_v3, 4 }
 0x220   : > { %v910_v31 = vpop.xlane.xlu1 %909  ;;  %v907_v9 = vpop.xlane.xlu0 %906 }
 0x221   : > { %v879_v8 = vadd.f32 %v878_v13, %v877_v26  ;;  %v884_v32 = vadd.f32 %v883_v27, %v882_v54  ;;  %v889_v16 = vadd.f32 %v888_v28, %v887_v3  ;;  %v926_v52 = vadd.f32 %v907_v9, %v904_v4 }
 0x223   : > { %956 = vst.msk [vmem:[%s1914_s25 + $0x1] sm:$0x1] %vm954_vm1, %v879_v8  ;;  %v885_v17 = vrot.slane %v884_v32, 1  ;;  %v890_v53 = vrot.slane %v889_v16, 2  ;;  %v927_v18 = vrot.slane %v926_v52, 4 }
 0x224   : > { %v913_v19 = vpop.xlane.xlu0 %912  ;;  %v916_v21 = vpop.xlane.xlu1 %915 }
 0x225   : > { %v886_v33 = vadd.f32 %v885_v17, %v884_v32  ;;  %v891_v20 = vadd.f32 %v890_v53, %v889_v16  ;;  %v928_v40 = vadd.f32 %v927_v18, %v926_v52  ;;  %v933_v12 = vadd.f32 %v913_v19, %v910_v31 }
 0x227   : > { %957 = vst.msk [vmem:[%s1914_s25 + $0x2] sm:$0x1] %vm954_vm1, %v886_v33  ;;  %v892_v11 = vrot.slane %v891_v20, 1  ;;  %v929_v22 = vrot.slane %v928_v40, 2  ;;  %v934_v23 = vrot.slane %v933_v12, 4 }
 0x228   : > { %v919_v57 = vpop.xlane.xlu0 %918  ;;  %v922_v37 = vpop.xlane.xlu1 %921 }
 0x229   : > { %v893_v58 = vadd.f32 %v892_v11, %v891_v20  ;;  %v930_v15 = vadd.f32 %v929_v22, %v928_v40  ;;  %v935_v14 = vadd.f32 %v934_v23, %v933_v12  ;;  %v940_v24 = vadd.f32 %v919_v57, %v916_v21 }
 0x22b   : > { %958 = vst.msk [vmem:[%s1914_s25 + $0x3] sm:$0x1] %vm954_vm1, %v893_v58  ;;  %v931_v59 = vrot.slane %v930_v15, 1  ;;  %v936_v36 = vrot.slane %v935_v14, 2  ;;  %v941_v60 = vrot.slane %v940_v24, 4 }
 0x22c   : > { %v925_v63 = vpop.xlane.xlu0 %924 }
 0x22d   : > { %v932_v0 = vadd.f32 %v931_v59, %v930_v15  ;;  %v937_v29 = vadd.f32 %v936_v36, %v935_v14  ;;  %v942_v1 = vadd.f32 %v941_v60, %v940_v24  ;;  %v947_v6 = vadd.f32 %v925_v63, %v922_v37 }
 0x22f   : > { %959 = vst.msk [vmem:[%s292_s0] sm:$0x1] %vm954_vm1, %v932_v0  ;;  %v938_v41 = vrot.slane %v937_v29, 1  ;;  %v943_v30 = vrot.slane %v942_v1, 2  ;;  %v948_v42 = vrot.slane %v947_v6, 4 }
 0x231   : > { %v939_v34 = vadd.f32 %v938_v41, %v937_v29  ;;  %v944_v38 = vadd.f32 %v943_v30, %v942_v1  ;;  %v949_v35 = vadd.f32 %v948_v42, %v947_v6 }
 0x233   : > { %960 = vst.msk [vmem:[%s292_s0 + $0x1] sm:$0x1] %vm954_vm1, %v939_v34  ;;  %v945_v39 = vrot.slane %v944_v38, 1  ;;  %v950_v43 = vrot.slane %v949_v35, 2 }
 0x235   : > { %v946_v46 = vadd.f32 %v945_v39, %v944_v38  ;;  %v951_v47 = vadd.f32 %v950_v43, %v949_v35 }
 0x237   : > { %961 = vst.msk [vmem:[%s292_s0 + $0x2] sm:$0x1] %vm954_vm1, %v946_v46  ;;  %v952_v45 = vrot.slane %v951_v47, 1 }
 0x239   : > { %v953_v44 = vadd.f32 %v952_v45, %v951_v47 }
 0x23b   : > { %962 = vst.msk [vmem:[%s292_s0 + $0x3] sm:$0x1] %vm954_vm1, %v953_v44 }
 0x23c PF: > { %p1266_p4 = scmp.ge.s32.totalorder %s1397_s20, 2  ;;  %s1017_s21 = sand.u32 1, %s1377_s15  }
 0x23d   : > { %s1018_s18 = scalar_lea.sflag [#allocation3], %s1017_s21 }
 0x23e   : > { %p1263_p2 = pnand %p1266_p4, %p1476_p8 }
 0x240   : > { %1372 = dma.done.wait (!%p1263_p2), %s1018_s18, 1024  }
 0x241   : > { %1374 = vsyncadd (!%p1263_p2), %s1018_s18, 4294966272  ;;  %s18_s20 = sadd.s32 1, %s1397_s20   ;;  %s1970_s15 = smov %s1381_s16 }
 0x242   : > { %p15_p3 = scmp.ge.s32.totalorder %s18_s20, 4   ;;  %s1971_s16 = smov %s1385_s17 }
 0x243   : > { %s1972_s17 = smov %s1482_s28  ;;  %s1973_s18 = smov %s1393_s19 }
 0x244   : > { %s1974_s19 = smov %s1976_s23  ;;  %17 = sbr.rel (!%p15_p3) target bundleno = 6 (0x6), region = 90 }
 0x24b   :  { %1045 = vsyncpa [#allocation3], 1 }
 0x24c   :  { %1047 = vsyncpa [#allocation3 + $0x1], 1 }

</bundles_post_ra>
